<compile_context>
chip_gen: v5e
topology: v5e:2x2
jax: 0.10.0
libtpu: 0.0.40
codegen_flags: <defaults>
</compile_context>

<pallas_src>
import jax
import jax.numpy as jnp
from jax.experimental import pallas as pl
from jax.experimental.pallas import tpu as pltpu

# FLAGS from the original repo (utils.flags.FLAGS()) — fixed deterministically here.
FLAGS_USE_BIAS = False
FLAGS_BATCH_NORM = True
BN_EPS = 1e-5


def _largest_aligned_divisor(total, align, cap):
    """Largest divisor of `total` that is a multiple of `align` and <= cap (fallback: total)."""
    best = None
    k = align
    limit = min(total, max(align, cap))
    while k <= limit:
        if total % k == 0:
            best = k
        k += align
    return best if best is not None else total


def _pick_row_tile(H, W, Cin, Cout, budget_bytes=8 << 20):
    # double-buffered (in + out) bytes per image row in the fused conv kernel
    per_row = 2 * 4 * W * (Cin + 4 * Cout)
    cap = max(8, budget_bytes // max(per_row, 1))
    return _largest_aligned_divisor(H, 8, cap)


def _stats_kernel(x_ref, s_ref, g_ref):
    # x_ref: (1, Cin, tpix).  Emit per-tile channel sums and channel Gram matrix.
    # BN batch statistics of the conv output are recovered analytically outside
    # (sum_y = S @ Wsum, sum_y2 = <G, W x W>), so the big conv output is never
    # materialized for statistics.
    xb = x_ref[0]                                               # (Cin, tpix)
    cin = xb.shape[0]
    s_ref[0] = jnp.sum(xb, axis=1, keepdims=True)               # (Cin, 1)
    # TODO(synk): for large Cin this O(Cin^2) VPU loop should become an MXU x @ x^T.
    cols = [jnp.sum(xb * xb[cj:cj + 1, :], axis=1, keepdims=True) for cj in range(cin)]
    g_ref[0] = jnp.concatenate(cols, axis=1)                    # (Cin, Cin)


def _conv_bn_relu_kernel(x_ref, r4_ref, w_ref, b_ref, o_ref):
    # x_ref: (1, Cin, th, W)
    # r4_ref: (W, 4W) constant 0/1 spreading matrix: column (kh*2W + 2w + kw) <- row w
    # w_ref: (Cin, Cout, 4W) weight pattern with BN scale folded in
    # b_ref: (Cout, 1) folded bias/BN shift
    # o_ref: (1, Cout, th, 4W)  -> contiguous reshape to (N, Cout, 2H, 2W) outside.
    cin = x_ref.shape[1]
    cout = o_ref.shape[1]
    r4 = r4_ref[...]
    # Spread each input-channel plane to the upsampled / interleaved lane layout on
    # the (otherwise idle) MXU:  xd[ci][i, kh*2W + 2w + kw] = x[ci, i, w].
    xd = [jnp.dot(x_ref[0, ci], r4, preferred_element_type=jnp.float32)
          for ci in range(cin)]
    # Tiny channel contraction (Cin FMAs per output plane) on the VPU.
    for co in range(cout):
        acc = xd[0] * w_ref[0, co:co + 1, :]
        for ci in range(1, cin):
            acc = acc + xd[ci] * w_ref[ci, co:co + 1, :]
        acc = acc + b_ref[co:co + 1, :]
        o_ref[0, co] = jnp.maximum(acc, 0.0).astype(o_ref.dtype)


def convolution_upsample(x, weight, bias, gamma, beta):
    """Forward pass of ConvolutionUpsample.  x: (N, Cin, H, W) f32, NCHW in/out."""
    N, Cin, H, W = x.shape
    Cout = weight.shape[1]
    W2, W4 = 2 * W, 4 * W
    HW = H * W
    f32 = jnp.float32

    # ---------------- BN batch statistics (training-mode forward) -------------------
    if FLAGS_BATCH_NORM:
        tpix = _largest_aligned_divisor(HW, 128, cap=(4 << 20) // max(1, 8 * Cin))
        n_tiles = HW // tpix
        T = N * n_tiles
        x3 = x.reshape(N, Cin, HW)                              # free reshape
        s_parts, g_parts = pl.pallas_call(
            _stats_kernel,
            out_shape=(jax.ShapeDtypeStruct((T, Cin, 1), f32),
                       jax.ShapeDtypeStruct((T, Cin, Cin), f32)),
            grid=(N, n_tiles),
            in_specs=[pl.BlockSpec((1, Cin, tpix), lambda n, t: (n, 0, t))],
            out_specs=(pl.BlockSpec((1, Cin, 1), lambda n, t: (n * n_tiles + t, 0, 0)),
                       pl.BlockSpec((1, Cin, Cin), lambda n, t: (n * n_tiles + t, 0, 0))),
            compiler_params=pltpu.CompilerParams(
                dimension_semantics=("parallel", "parallel"),
                vmem_limit_bytes=32 * 1024 * 1024),
        )(x3)
        S = jnp.sum(s_parts[:, :, 0], axis=0)                   # (Cin,)   sum_pixels x[ci]
        G = jnp.sum(g_parts, axis=0)                            # (Cin,Cin) sum_pixels x[ci]x[cj]
        count = jnp.float32(N * 4 * HW)                         # N * 2H * 2W
        Wsum = jnp.sum(weight, axis=(2, 3))                     # (Cin, Cout)
        mean_lin = (S @ Wsum) / count                           # mean of bias-free conv output
        WW = jnp.einsum("iopq,jopq->ijo", weight, weight)       # (Cin, Cin, Cout)
        e2_lin = jnp.einsum("ij,ijo->o", G, WW) / count
        var = e2_lin - mean_lin * mean_lin                      # biased variance (shift-invariant)
        # TODO(synk): shifted/Welford-style accumulation would be more robust than
        # E[y^2]-E[y]^2 for very large batches / large means.
        scale = gamma * jax.lax.rsqrt(var + BN_EPS)
        b_eff = beta - mean_lin * scale                         # conv bias cancels inside BN
        # TODO(synk): running_mean/running_var buffer updates (training side effect) not modeled.
    else:
        scale = jnp.ones((Cout,), f32)
        b_eff = bias.astype(f32) if FLAGS_USE_BIAS else jnp.zeros((Cout,), f32)

    # ------------- fold weights / BN scale into a lane pattern over (kh, 2w+kw) -----
    d = jnp.arange(W4)
    kh_idx = d // W2                                            # which of the 2 output rows
    kw_idx = d % 2                                              # which of the 2 output columns
    wpat = (weight[:, :, kh_idx, kw_idx] * scale[None, :, None]).astype(f32)   # (Cin,Cout,4W)
    r4 = (jnp.arange(W)[:, None] == ((d[None, :] % W2) // 2)).astype(f32)      # (W, 4W)
    b2d = jnp.reshape(b_eff, (Cout, 1)).astype(f32)

    # ------------- fused conv-transpose + BN affine + ReLU, NCHW output -------------
    th = _pick_row_tile(H, W, Cin, Cout)
    out4 = pl.pallas_call(
        _conv_bn_relu_kernel,
        out_shape=jax.ShapeDtypeStruct((N, Cout, H, W4), x.dtype),
        grid=(N, H // th),
        in_specs=[pl.BlockSpec((1, Cin, th, W), lambda n, h: (n, 0, h, 0)),
                  pl.BlockSpec((W, W4), lambda n, h: (0, 0)),
                  pl.BlockSpec((Cin, Cout, W4), lambda n, h: (0, 0, 0)),
                  pl.BlockSpec((Cout, 1), lambda n, h: (0, 0))],
        out_specs=pl.BlockSpec((1, Cout, th, W4), lambda n, h: (n, 0, h, 0)),
        compiler_params=pltpu.CompilerParams(
            dimension_semantics=("parallel", "parallel"),
            vmem_limit_bytes=32 * 1024 * 1024),
    )(x, r4, wpat, b2d)

    # (H, 4W) -> (2H, 2W): contiguous (free) reshape; flat index i*4W + kh*2W + 2w + kw
    # equals (2i+kh)*2W + (2w+kw).
    return out4.reshape(N, Cout, 2 * H, 2 * W)


def reference(x, weight, bias, gamma, beta):
    """Pure-JAX reference matching the PyTorch forward (training-mode BN)."""
    t = jnp.einsum("nchw,copq->nohpwq", x, weight)              # (N, Cout, H, 2, W, 2)
    N, Cout, H, _, W, _ = t.shape
    y = t.reshape(N, Cout, 2 * H, 2 * W)
    if FLAGS_USE_BIAS:
        y = y + bias[None, :, None, None]
    if FLAGS_BATCH_NORM:
        mean = y.mean(axis=(0, 2, 3), keepdims=True)
        var = y.var(axis=(0, 2, 3), keepdims=True)              # biased variance
        y = (y - mean) * jax.lax.rsqrt(var + BN_EPS)
        y = y * gamma[None, :, None, None] + beta[None, :, None, None]
    return jnp.maximum(y, 0.0)


if __name__ == "__main__":
    key = jax.random.PRNGKey(0)
    k1, k2, k3, k4, k5 = jax.random.split(key, 5)

    N, Cin, H, W, Cout = 2, 4, 16, 16, 8
    x = jax.random.normal(k1, (N, Cin, H, W), jnp.float32)
    weight = jax.random.normal(k2, (Cin, Cout, 2, 2), jnp.float32) * 0.1  # ConvTranspose2d weight
    bias = jax.random.normal(k3, (Cout,), jnp.float32) * 0.1
    gamma = jax.random.uniform(k4, (Cout,), jnp.float32, minval=0.5, maxval=1.5)
    beta = jax.random.normal(k5, (Cout,), jnp.float32) * 0.1

    out = convolution_upsample(x, weight, bias, gamma, beta)
    out = jax.block_until_ready(out)

    assert out.shape == (N, Cout, 2 * H, 2 * W), out.shape
    ref = reference(x, weight, bias, gamma, beta)
    err = float(jnp.max(jnp.abs(out - ref)))
    assert jnp.allclose(out, ref, atol=1e-4, rtol=1e-4), f"max abs err {err}"
    print("KERNEL_OK")
</pallas_src>

<mosaic_0001>
module attributes {stable_mosaic.version = 11 : i64} {
  func.func @_stats_kernel(%arg0: i32, %arg1: i32, %arg2: memref<1x4x256xf32, #tpu.memory_space<vmem>>, %arg3: memref<1x4x1xf32, #tpu.memory_space<vmem>>, %arg4: memref<1x4x4xf32, #tpu.memory_space<vmem>>) attributes {dimension_semantics = [#tpu.dimension_semantics<parallel>, #tpu.dimension_semantics<parallel>], iteration_bounds = array<i64: 2, 1>, scalar_prefetch = 0 : i64, scratch_operands = 0 : i64, tpu.core_type = #tpu.core_type<tc>, window_params = [{transform_indices = @transform_0, window_bounds = array<i64: 1, 4, 256>}, {transform_indices = @transform_1, window_bounds = array<i64: 1, 4, 1>}, {transform_indices = @transform_2, window_bounds = array<i64: 1, 4, 4>}]} {
    %c0 = arith.constant 0 : index
    %c0_0 = arith.constant 0 : index
    %c0_1 = arith.constant 0 : index
    %0 = vector.load %arg2[%c0, %c0_0, %c0_1] : memref<1x4x256xf32, #tpu.memory_space<vmem>>, vector<1x4x256xf32>
    %1 = vector.shape_cast %0 : vector<1x4x256xf32> to vector<4x256xf32>
    %cst = arith.constant dense<0.000000e+00> : vector<4xf32>
    %2 = vector.multi_reduction <add>, %1, %cst [1] : vector<4x256xf32> to vector<4xf32>
    %3 = vector.shape_cast %2 : vector<4xf32> to vector<4x1xf32>
    %c0_2 = arith.constant 0 : index
    %c0_3 = arith.constant 0 : index
    %c0_4 = arith.constant 0 : index
    %4 = vector.load %arg3[%c0_2, %c0_3, %c0_4] : memref<1x4x1xf32, #tpu.memory_space<vmem>>, vector<1x4x1xf32>
    %5 = vector.shape_cast %4 : vector<1x4x1xf32> to vector<4x1xf32>
    %6 = vector.shape_cast %3 : vector<4x1xf32> to vector<1x4x1xf32>
    tpu.vector_store %arg3[%c0_2, %c0_3, %c0_4], %6 {strides = array<i32>} : memref<1x4x1xf32, #tpu.memory_space<vmem>>, vector<1x4x1xf32>,
    %7 = vector.extract_strided_slice %1 {offsets = [0, 0], sizes = [1, 256], strides = [1, 1]} : vector<4x256xf32> to vector<1x256xf32>
    %8 = vector.broadcast %7 : vector<1x256xf32> to vector<4x256xf32>
    %9 = arith.mulf %1, %8 : vector<4x256xf32>
    %cst_5 = arith.constant dense<0.000000e+00> : vector<4xf32>
    %10 = vector.multi_reduction <add>, %9, %cst_5 [1] : vector<4x256xf32> to vector<4xf32>
    %11 = vector.shape_cast %10 : vector<4xf32> to vector<4x1xf32>
    %12 = vector.extract_strided_slice %1 {offsets = [1, 0], sizes = [1, 256], strides = [1, 1]} : vector<4x256xf32> to vector<1x256xf32>
    %13 = vector.broadcast %12 : vector<1x256xf32> to vector<4x256xf32>
    %14 = arith.mulf %1, %13 : vector<4x256xf32>
    %cst_6 = arith.constant dense<0.000000e+00> : vector<4xf32>
    %15 = vector.multi_reduction <add>, %14, %cst_6 [1] : vector<4x256xf32> to vector<4xf32>
    %16 = vector.shape_cast %15 : vector<4xf32> to vector<4x1xf32>
    %17 = vector.extract_strided_slice %1 {offsets = [2, 0], sizes = [1, 256], strides = [1, 1]} : vector<4x256xf32> to vector<1x256xf32>
    %18 = vector.broadcast %17 : vector<1x256xf32> to vector<4x256xf32>
    %19 = arith.mulf %1, %18 : vector<4x256xf32>
    %cst_7 = arith.constant dense<0.000000e+00> : vector<4xf32>
    %20 = vector.multi_reduction <add>, %19, %cst_7 [1] : vector<4x256xf32> to vector<4xf32>
    %21 = vector.shape_cast %20 : vector<4xf32> to vector<4x1xf32>
    %22 = vector.extract_strided_slice %1 {offsets = [3, 0], sizes = [1, 256], strides = [1, 1]} : vector<4x256xf32> to vector<1x256xf32>
    %23 = vector.broadcast %22 : vector<1x256xf32> to vector<4x256xf32>
    %24 = arith.mulf %1, %23 : vector<4x256xf32>
    %cst_8 = arith.constant dense<0.000000e+00> : vector<4xf32>
    %25 = vector.multi_reduction <add>, %24, %cst_8 [1] : vector<4x256xf32> to vector<4xf32>
    %26 = vector.shape_cast %25 : vector<4xf32> to vector<4x1xf32>
    %27 = tpu.concatenate %11, %16, %21, %26 in 1 : vector<4x1xf32>, vector<4x1xf32>, vector<4x1xf32>, vector<4x1xf32> -> vector<4x4xf32>
    %c0_9 = arith.constant 0 : index
    %c0_10 = arith.constant 0 : index
    %c0_11 = arith.constant 0 : index
    %28 = vector.load %arg4[%c0_9, %c0_10, %c0_11] : memref<1x4x4xf32, #tpu.memory_space<vmem>>, vector<1x4x4xf32>
    %29 = vector.shape_cast %28 : vector<1x4x4xf32> to vector<4x4xf32>
    %30 = vector.shape_cast %27 : vector<4x4xf32> to vector<1x4x4xf32>
    tpu.vector_store %arg4[%c0_9, %c0_10, %c0_11], %30 {strides = array<i32>} : memref<1x4x4xf32, #tpu.memory_space<vmem>>, vector<1x4x4xf32>,
    return
  }
  func.func @transform_0(%arg0: i32, %arg1: i32) -> (i32, i32, i32) {
    %c0_i32 = arith.constant 0 : i32
    %c0_i32_0 = arith.constant 0 : i32
    return %arg0, %c0_i32, %arg1 : i32, i32, i32
  }
  func.func @transform_1(%arg0: i32, %arg1: i32) -> (i32, i32, i32) {
    %c1_i32 = arith.constant 1 : i32
    %0 = arith.muli %arg0, %c1_i32 : i32
    %1 = arith.addi %0, %arg1 : i32
    %c0_i32 = arith.constant 0 : i32
    %c0_i32_0 = arith.constant 0 : i32
    %c0_i32_1 = arith.constant 0 : i32
    return %1, %c0_i32, %c0_i32_0 : i32, i32, i32
  }
  func.func @transform_2(%arg0: i32, %arg1: i32) -> (i32, i32, i32) {
    %c1_i32 = arith.constant 1 : i32
    %0 = arith.muli %arg0, %c1_i32 : i32
    %1 = arith.addi %0, %arg1 : i32
    %c0_i32 = arith.constant 0 : i32
    %c0_i32_0 = arith.constant 0 : i32
    %c0_i32_1 = arith.constant 0 : i32
    return %1, %c0_i32, %c0_i32_0 : i32, i32, i32
  }
}

</mosaic_0001>

<bundles_post_ra>
// kernel: tpu_custom_call.1
= control target key start
LH: loop header
LB: loop body
LE: loop exit
PB: predicated region body
PF: predicated region fallthrough
CT: control target
= control target key end

     0   :  { %8 = vsyncpa [#allocation3], 0  ;;  %s793_s0 = inlined_call_operand.hbm [shape: f32[2,4,256], index: 0, kind: input, shape index: {}]   ;;  %s794_s1 = inlined_call_operand.vmem [shape: f32[2,4,1], index: 1, kind: output, shape index: {0}]   ;;  %s795_s2 = inlined_call_operand.hbm [shape: f32[2,4,4], index: 2, kind: output, shape index: {1}]  }
   0x1   :  { %10 = vsyncpa [#allocation3 + $0x1], 0 }
   0x2   :  { %11 = vsyncpa [#allocation4], 0 }
   0x3   :  { %13 = vsyncpa [#allocation4 + $0x1], 0  ;;  %s653_s9 = smov 0   ;;  %s655_s10 = smov 0  }
   0x4   :  { %s657_s11 = smov 0   ;;  %s659_s12 = smov 0  }
   0x5   :  { %s661_s13 = smov 0   ;;  %s663_s14 = smov 0  }
   0x6 LB: > { %s446_s15 = sadd.s32 4294967295, %s636_s14   ;;  %s447_s16 = sadd.s32 4294967294, %s636_s14   ;;  %s636_s14 = sphi %s663_s14, %s19_s14   ;;  %s632_s13 = sphi %s661_s13, %s804_s13   ;;  %s628_s12 = sphi %s659_s12, %s803_s12   ;;  %s624_s11 = sphi %s657_s11, %s802_s11   ;;  %s620_s10 = sphi %s655_s10, %s801_s10   ;;  %s616_s9 = sphi %s653_s9, %s800_s9  }
   0x7   : > { %s31_s17 = sadd.s32 1, %s632_s13  ;;  %s40_s18 = sadd.s32 1, %s624_s11 }
   0x8   : > { %p33_p0 = scmp.ge.s32.totalorder %s31_s17, 2  ;;  %p47_p1 = scmp.ne.s32.totalorder %s624_s11, %s620_s10 }
   0x9   : > { %p48_p2 = scmp.eq.s32.totalorder %s636_s14, 0  ;;  %p53_p3 = scmp.ne.s32.totalorder %s620_s10, %s616_s9 }
   0xa   : > { %s806_s17 = smov (%p33_p0, %s31_s17), 0  ;;  %p54_p5 = scmp.eq.s32.totalorder %s446_s15, 0 }
   0xb   : > { %p694_p4 = por %p48_p2, %p47_p1  ;;  %s35_s20 = ssub.s32 %s632_s13, %s806_s17 }
   0xc   : > { %p107_p6 = scmp.eq.s32.totalorder %s446_s15, 1  ;;  %p38_p7 = scmp.eq.s32.totalorder %s35_s20, 0 }
   0xd   : > { %p700_p8 = por %p54_p5, %p53_p3  ;;  %p113_p10 = scmp.eq.s32.totalorder %s447_s16, 1 }
   0xe   : > { %p704_p9 = por %p107_p6, %p47_p1  ;;  %p449_p12 = scmp.ge.s32.totalorder %s636_s14, 2 }
   0xf   : > { %s709_s23 = scalar_select %p38_p7, %s624_s11, %s40_s18  }
  0x10   : > { %p711_p11 = por %p113_p10, %p53_p3  ;;  %p474_p13 = scmp.lt.s32.totalorder %s636_s14, 2 }
  0x11   : > { %s133_s25 = sand.u32 1, %s624_s11   ;;  %s461_s27 = sshll.u32 %s632_s13, 3 }
  0x12   : > { %s450_s26 = sshll.u32 %s133_s25, 3  ;;  %s144_s30 = scalar_lea.hbm %s793_s0, %s461_s27 }
  0x13   : > { %s137_s3 = scalar_lea.vmem [#allocation2], %s450_s26  ;;  %s146_s5 = sshll.u32 %s144_s30, 4  ;;  %s147_s5 = int_to_ptr.hbm [resolvable:$true] %s146_s5 }
  0x14   : > { %s148_s4 = sshll.u32 %s137_s3, 4  ;;  %p467_p0 = pnand %p474_p13, %p694_p4  ;;  %s149_s4 = int_to_ptr.vmem [resolvable:$true] %s148_s4 }
  0x15   : > { %p453_p1 = scmp.ge.s32.totalorder %s636_s14, 1  ;;  %p153_p2 = scmp.lt.s32.totalorder %s636_s14, 3 }
  0x16   : > { %s134_s6 = scalar_lea.sflag [#allocation3], %s133_s25 }
  0x17   : > { %469 = dma.hbm_to_vmem [thread:$0]  (!%p467_p0), %s147_s5, 128, %s149_s4, %s134_s6  }
  0x18   : > { %p154_p3 = pnand %p453_p1, %p153_p2 }
  0x19   : > { %s727_s7 = sand.u32 (!%p154_p3), 1, %s620_s10  }
  0x1a   : > { %157 = sbr.rel (%p154_p3) target bundleno = 197 (0xc5), region = 24  ;;  %s454_s8 = sshll.u32 (!%p154_p3), %s727_s7, 3 }
  0x1b   : > { %s160_s15 = scalar_lea.sflag (!%p154_p3), [#allocation3], %s727_s7  ;;  %s163_s16 = scalar_lea.vmem (!%p154_p3), [#allocation2], %s454_s8 }
  0x1f   : > { %607 = dma.done.wait (%p700_p8), %s160_s15, 128  }
  0x20   : > { %609 = vsyncadd (%p700_p8), %s160_s15, 4294967168  ;;  %v198_v0 = vld [vmem:[%s163_s16] sm:$0xff]  ;;  %vm205_vm0 = vcmask 1043456   ;;  %p192_p4 = scmp.lt.s32.totalorder %s628_s12, 1  ;;  %vm211_vm1 = vcmask 3072   ;;  %s455_s26 = sshll.u32 %s727_s7, 2 }
  0x21   : > { %200 = vst [vmem:[#allocation1] ss:$2 sm:$0xff] %v198_v0  ;;  %v213_v1 = vperm.slane %v198_v0, 0  ;;  %v214_v2 = vperm.slane %v198_v0, 4  ;;  %v237_v3 = vperm.slane %v198_v0, 5  ;;  %v236_v6 = vperm.slane %v198_v0, 1 }
  0x22   : > { %v260_v12 = vperm.slane %v198_v0, 6  ;;  %v259_v17 = vperm.slane %v198_v0, 2  ;;  %v283_v25 = vperm.slane %v198_v0, 7  ;;  %v282_v32 = vperm.slane %v198_v0, 3  ;;  %s193_s18 = scalar_select %p192_p4, %s628_s12, 1 }
  0x23   : > { %v217_v4 = vperm.slane %v213_v1, 0  ;;  %v218_v5 = vperm.slane %v214_v2, 0  ;;  %v241_v7 = vperm.slane %v237_v3, 1  ;;  %v240_v10 = vperm.slane %v236_v6, 1  ;;  %s458_s27 = sshll.u32 %s628_s12, 2  ;;  %s189_s3 = scalar_lea.vmem [#allocation5], %s455_s26 }
  0x24   : > { %v264_v18 = vperm.slane %v260_v12, 2  ;;  %v263_v23 = vperm.slane %v259_v17, 2  ;;  %v287_v33 = vperm.slane %v283_v25, 3  ;;  %v286_v35 = vperm.slane %v282_v32, 3  ;;  %s456_s19 = sshll.u32 %s193_s18, 2  ;;  %s334_s30 = scalar_lea.hbm %s795_s2, %s458_s27 }
  0x25   : > { %v221_v8 = vrot.slane %v218_v5, 4  ;;  %v244_v11 = vrot.slane %v241_v7, 4  ;;  %s195_s25 = scalar_lea.vmem %s794_s1, %s456_s19  ;;  %vm305_vm2 = vcmask 7168   ;;  %vm307_vm3 = vcmask 15360   ;;  %s336_s4 = sshll.u32 %s189_s3, 4  ;;  %s337_s4 = int_to_ptr.vmem [resolvable:$true] %s336_s4 }
  0x26   : > { %v267_v24 = vrot.slane %v264_v18, 4  ;;  %v290_v36 = vrot.slane %v287_v33, 4  ;;  %s338_s5 = sshll.u32 %s334_s30, 4  ;;  %vm309_vm4 = vcmask 23552   ;;  %vm311_vm5 = vcmask 27648   ;;  %s319_s12 = scalar_lea.sflag [#allocation4], %s727_s7  ;;  %s339_s5 = int_to_ptr.hbm [resolvable:$true] %s338_s5 }
  0x27   : > { %v222_v9 = vsel %vm205_vm0, %v217_v4, %v221_v8  ;;  %v245_v16 = vsel %vm205_vm0, %v240_v10, %v244_v11  ;;  %s568_s6 = sshra.s32 %s339_s5, 4  ;;  %s574_s18 = scalar_lea.hbm %s795_s2, 8  ;;  %s569_s6 = int_to_ptr.hbm [resolvable:$true] %s568_s6 }
  0x28   : > { %v201_v13 = vld.sshfl [vmem:[#allocation1] sm:$0xff pattern:$0x75316420]  ;;  %v202_v14 = vld.sshfl [vmem:[#allocation1 + $0x8] sm:$0xff pattern:$0x75316420]  ;;  %v224_v15 = vmul.f32 %v222_v9, %v198_v0  ;;  %v247_v22 = vmul.f32 %v245_v16, %v198_v0  ;;  %v268_v31 = vsel %vm205_vm0, %v263_v23, %v267_v24  ;;  %v291_v42 = vsel %vm205_vm0, %v286_v35, %v290_v36  ;;  %p575_p8 = scmp.lt.s32.totalorder %s569_s6, %s795_s2 }
  0x29   : > { %v206_v19 = vsel %vm205_vm0, %v201_v13, 0.0  ;;  %v207_v20 = vsel %vm205_vm0, %v202_v14, 0.0  ;;  %v270_v34 = vmul.f32 %v268_v31, %v198_v0  ;;  %v293_v43 = vmul.f32 %v291_v42, %v198_v0  ;;  %s570_s8 = scalar_lea.hbm %s569_s6, 4 }
  0x2a   : > { %226 = vst [vmem:[#allocation1] ss:$2 sm:$0xff] %v224_v15  ;;  %v208_v21 = vadd.f32 %v207_v20, %v206_v19  ;;  %p571_p5 = scmp.ne.s32.totalorder %s569_s6, %s570_s8  ;;  %p576_p10 = scmp.lt.s32.totalorder %s574_s18, %s570_s8 }
  0x2c   : > { %209 = vadd.xlane.f32.xlu2 %v208_v21  ;;  %p572_p6 = pnand %p571_p5, %p704_p9  ;;  %p577_p13 = por %p576_p10, %p575_p8 }
  0x2e   : > { %p573_p7 = pneg %p572_p6 }
  0x30   : > { %p578_p0 = pnand %p577_p13, %p573_p7 }
  0x31   : > { %v227_v26 = vld.sshfl [vmem:[#allocation1] sm:$0xff pattern:$0x75316420]  ;;  %v228_v27 = vld.sshfl [vmem:[#allocation1 + $0x8] sm:$0xff pattern:$0x75316420] }
  0x32   : > { %v231_v28 = vsel %vm205_vm0, %v227_v26, 0.0  ;;  %v232_v29 = vsel %vm205_vm0, %v228_v27, 0.0  ;;  %249 = vst [vmem:[#allocation1] ss:$2 sm:$0xff] %v247_v22 }
  0x33   : > { %v233_v30 = vadd.f32 %v232_v29, %v231_v28 }
  0x35   : > { %234 = vadd.xlane.f32.xlu0 %v233_v30 }
  0x39   : > { %v250_v37 = vld.sshfl [vmem:[#allocation1] sm:$0xff pattern:$0x75316420]  ;;  %v251_v38 = vld.sshfl [vmem:[#allocation1 + $0x8] sm:$0xff pattern:$0x75316420] }
  0x3a   : > { %v254_v39 = vsel %vm205_vm0, %v250_v37, 0.0  ;;  %v255_v40 = vsel %vm205_vm0, %v251_v38, 0.0  ;;  %272 = vst [vmem:[#allocation1] ss:$2 sm:$0xff] %v270_v34 }
  0x3b   : > { %v256_v41 = vadd.f32 %v255_v40, %v254_v39 }
  0x3d   : > { %257 = vadd.xlane.f32.xlu0 %v256_v41 }
  0x41   : > { %v273_v44 = vld.sshfl [vmem:[#allocation1] sm:$0xff pattern:$0x75316420]  ;;  %v274_v45 = vld.sshfl [vmem:[#allocation1 + $0x8] sm:$0xff pattern:$0x75316420] }
  0x42   : > { %v277_v46 = vsel %vm205_vm0, %v273_v44, 0.0  ;;  %v278_v47 = vsel %vm205_vm0, %v274_v45, 0.0  ;;  %295 = vst [vmem:[#allocation1] ss:$2 sm:$0xff] %v293_v43 }
  0x43   : > { %v279_v48 = vadd.f32 %v278_v47, %v277_v46 }
  0x45   : > { %280 = vadd.xlane.f32.xlu1 %v279_v48 }
  0x49   : > { %v296_v49 = vld.sshfl [vmem:[#allocation1] sm:$0xff pattern:$0x75316420]  ;;  %v297_v50 = vld.sshfl [vmem:[#allocation1 + $0x8] sm:$0xff pattern:$0x75316420] }
  0x4a   : > { %v300_v51 = vsel %vm205_vm0, %v296_v49, 0.0  ;;  %v301_v52 = vsel %vm205_vm0, %v297_v50, 0.0 }
  0x4b   : > { %v302_v53 = vadd.f32 %v301_v52, %v300_v51 }
  0x4d   : > { %303 = vadd.xlane.f32.xlu1 %v302_v53 }
  0x9f   : > { %v210_v54 = vpop.xlane.xlu2 %209 }
  0xa0   : > { %212 = vst.msk [vmem:[%s195_s25] sm:$0xf] %vm211_vm1, %v210_v54 }
  0xa8   : > { %v235_v55 = vpop.xlane.xlu0 %234 }
  0xb0   : > { %v258_v57 = vpop.xlane.xlu0 %257 }
  0xb1   : > { %v306_v58 = vsel %vm305_vm2, %v235_v55, %v258_v57 }
  0xb8   : > { %v281_v56 = vpop.xlane.xlu1 %280 }
  0xb9   : > { %v308_v59 = vsel %vm307_vm3, %v306_v58, %v281_v56 }
  0xc0   : > { %v304_v60 = vpop.xlane.xlu1 %303 }
  0xc1   : > { %v310_v61 = vsel %vm309_vm4, %v308_v59, %v304_v60 }
  0xc2   : > { %312 = vst.msk [vmem:[%s189_s3] sm:$0xf] %vm311_vm5, %v310_v61 }
  0xc3   : > { %581 = shalt.err (!%p578_p0)
}
  0xc4   : > { %464 = dma.vmem_to_hbm [thread:$0]  (%p704_p9), %s337_s4, 64, %s339_s5, %s319_s12  }
  0xc5 PF: > { %s358_s7 = sand.u32 1, %s616_s9   ;;  %p471_p1 = pnand %p449_p12, %p711_p11 }
  0xc6   : > { %s359_s21 = scalar_lea.sflag [#allocation4], %s358_s7 }
  0xc7   : > { %p472_p2 = pneg %p471_p1 }
  0xc9   : > { %611 = dma.done.wait (%p472_p2), %s359_s21, 64  }
  0xca   : > { %613 = vsyncadd (%p472_p2), %s359_s21, 4294967232  ;;  %s19_s14 = sadd.s32 1, %s636_s14   ;;  %s800_s9 = smov %s620_s10 }
  0xcb   : > { %p16_p3 = scmp.ge.s32.totalorder %s19_s14, 4   ;;  %s801_s10 = smov %s624_s11 }
  0xcc   : > { %s802_s11 = smov %s709_s23  ;;  %s803_s12 = smov %s632_s13 }
  0xcd   : > { %s804_s13 = smov %s806_s17  ;;  %18 = sbr.rel (!%p16_p3) target bundleno = 6 (0x6), region = 81 }
  0xd2   :  { %365 = vsyncpa [#allocation3], 1 }
  0xd3   :  { %367 = vsyncpa [#allocation3 + $0x1], 1 }
  0xd4   :  { %368 = vsyncpa [#allocation4], 1 }
  0xd5   :  { %370 = vsyncpa [#allocation4 + $0x1], 1 }

</bundles_post_ra>
